<compile_context>
chip_gen: v5e
topology: v5e:2x2
jax: 0.10.0
libtpu: 0.0.40
codegen_flags: <defaults>
</compile_context>

<pallas_src>
import functools

import jax
import jax.numpy as jnp
from jax import lax
from jax.experimental import pallas as pl
from jax.experimental.pallas import tpu as pltpu


# -----------------------------------------------------------------------------
# Kernel
# -----------------------------------------------------------------------------
def _dr_block_kernel(H, x_ref, sa_ref, ba_ref, w1_ref, s2_ref, b2_ref, w2_ref,
                     s3_ref, b3_ref, sl_ref, bl_ref, wo_ref, out_ref):
    """One grid step = G whole images, lane-folded: rows = (image, h), lanes = (w, c).

    x_ref : (G*H, W*C)    bf16  folded input images
    sa/ba : (1, W*C)      f32   folded BN scale/shift, M-path BN #1
    w1    : (W*C, W*C)    bf16  block-diagonal 1x1 conv C->C
    s2/b2 : (1, W*C)      f32   folded BN after conv1
    w2    : (3*W*C, W*C)  bf16  merged banded 3x3 conv (K stacks the dy=-1/0/+1 bands;
                                the dx zero padding at the W borders is baked in)
    s3/b3 : (1, W*C)      f32   folded BN after conv2
    sl/bl : (1, W*C)      f32   folded BN of the layer path
    wo    : (2*W*C, W*2C) bf16  merged output weight [w3 block-diag ; wl block-diag]
    out   : (G*H, W*2C)   f32   lane-dense output
    """
    f32 = jnp.float32
    bf16 = jnp.bfloat16
    GH, KC = x_ref.shape

    x = x_ref[...].astype(f32)                                    # (GH, KC)

    # ---------------- M path: BN+ReLU, 1x1 conv C->C, BN+ReLU -----------------
    h0 = jnp.maximum(x * sa_ref[...] + ba_ref[...], 0.0)
    y1 = jnp.dot(h0.astype(bf16), w1_ref[...], preferred_element_type=f32)
    y1 = jnp.maximum(y1 * s2_ref[...] + b2_ref[...], 0.0)         # (GH, KC) f32

    # ---------------- 3x3 conv: ONE matmul with K = 3*W*C ---------------------
    # dy=+-1 row shifts are built in VMEM; the top/bottom conv zero padding and any
    # cross-image leakage (when G > 1 images share a step) are killed by an iota mask.
    zrow = jnp.zeros((1, KC), f32)
    yp = jnp.concatenate([zrow, y1, zrow], axis=0)                # (GH+2, KC)
    row = lax.broadcasted_iota(jnp.int32, (GH, KC), 0) % H        # image-local row
    y_up = jnp.where(row == 0, 0.0, yp[0:GH, :])                  # source row h-1
    y_dn = jnp.where(row == H - 1, 0.0, yp[2:GH + 2, :])          # source row h+1
    lhs = jnp.concatenate([y_up, y1, y_dn], axis=1).astype(bf16)  # (GH, 3*KC)
    acc = jnp.dot(lhs, w2_ref[...], preferred_element_type=f32)   # (GH, KC)
    h2 = jnp.maximum(acc * s3_ref[...] + b3_ref[...], 0.0)

    # ---------------- layer path: BN+ReLU --------------------------------------
    hl = jnp.maximum(x * sl_ref[...] + bl_ref[...], 0.0)

    # ---------------- both output 1x1 convs fused into ONE matmul --------------
    big = jnp.concatenate([h2, hl], axis=1).astype(bf16)          # (GH, 2*KC)
    out = jnp.dot(big, wo_ref[...], preferred_element_type=f32)   # (GH, W*2C)
    out_ref[...] = out.astype(out_ref.dtype)                      # lane-dense store


# -----------------------------------------------------------------------------
# Wrapper-side weight folding (pure JAX, runs once per call / once under jit)
# -----------------------------------------------------------------------------
def _block_diag(w, reps):
    """(Cin, Cout) -> (reps*Cin, reps*Cout) block-diagonal (one block per pixel)."""
    cin, cout = w.shape
    eye = jnp.eye(reps, dtype=w.dtype)
    return jnp.einsum("pq,io->piqo", eye, w).reshape(reps * cin, reps * cout)


def _conv_band(w_dy, W):
    """w_dy: (3, Cin, Cout) = the dx taps of one 3x3-kernel row.  Returns the banded
    (W*Cin, W*Cout) matrix so `lane_folded_row @ band` is that kernel row's conv
    contribution; the dx=+-1 zero padding at the image's W borders is baked in."""
    _, c, co = w_dy.shape
    src = jnp.arange(W)
    band = jnp.zeros((W, c, W, co), w_dy.dtype)
    for dx in range(3):
        s = jnp.arange(W) + (dx - 1)              # source pixel of each output pixel
        valid = (s >= 0) & (s < W)
        sel = ((src[:, None] == s[None, :]) & valid[None, :]).astype(w_dy.dtype)
        band = band + sel[:, None, :, None] * w_dy[dx][None, :, None, :]
    return band.reshape(W * c, W * co)


# -----------------------------------------------------------------------------
# Grid-step sizing & VMEM budget
# -----------------------------------------------------------------------------
def _vmem_capacity_bytes(default=64 * 2 ** 20):
    try:
        return int(getattr(pltpu.get_tpu_info(), "vmem_capacity_bytes", default))
    except Exception:
        return default


def _choose_group(N, H, KC, OC, vmem_cap, target_step_bytes):
    """Images per grid step: big enough to amortize the ~0.35us/step overhead and keep
    DMAs large, small enough to fit VMEM, and >=2 steps when N allows (megacore)."""
    divs = [d for d in range(1, N + 1) if N % d == 0]
    # bf16 input blocks want the second-minor block dim to be a multiple of 16
    # (f32 output wants 8) unless the block covers the whole array.
    legal = [d for d in divs if (d * H) % 16 == 0 or d == N]
    step_bytes = lambda d: d * H * (KC * 2 + OC * 4)          # bf16 in + f32 out
    work_bytes = lambda d: 2 * step_bytes(d) + 48 * d * H * KC  # + temporaries (est.)
    G = legal[-1]
    for d in legal:
        if step_bytes(d) >= target_step_bytes:
            G = d
            break
    multi = [d for d in legal if N // d >= 2]
    if N // G < 2 and multi:          # keep both v7x TensorCores busy when possible
        G = max(multi)
    while work_bytes(G) > vmem_cap // 2 and any(d < G for d in legal):
        G = max(d for d in legal if d < G)
    return G


# -----------------------------------------------------------------------------
# Public forward
# -----------------------------------------------------------------------------
def dr_block(x_nchw, p, *, group=None, target_step_bytes=512 * 1024):
    """DR_Block forward.  Input/output are NCHW (PyTorch convention).

    In a full network you would keep activations in the kernel's lane-folded
    (rows, W*C) layout end-to-end; the NCHW<->NHWC transposes here exist only for
    interface parity with the PyTorch module and are the only extra HBM passes left.
    """
    N, C, H, W = x_nchw.shape
    C2 = 2 * C
    KC = W * C
    OC = W * C2

    bf16 = jnp.bfloat16
    f32 = jnp.float32

    # NCHW -> NHWC -> lane-folded (N*H, W*C), stored bf16 in HBM (element-wise BN math
    # stays f32 inside the kernel).  No H/W zero-pad, no halo-tile materialization.
    x_folded = jnp.transpose(x_nchw, (0, 2, 3, 1)).reshape(N * H, KC).astype(bf16)

    # Folded BN vectors (f32) and structured bf16 MXU weights, built once.
    sa_t = jnp.tile(p["sa"].astype(f32), (1, W))
    ba_t = jnp.tile(p["ba"].astype(f32), (1, W))
    s2_t = jnp.tile(p["s2"].astype(f32), (1, W))
    b2_t = jnp.tile(p["b2"].astype(f32), (1, W))
    s3_t = jnp.tile(p["s3"].astype(f32), (1, W))
    b3_t = jnp.tile(p["b3"].astype(f32), (1, W))
    sl_t = jnp.tile(p["sl"].astype(f32), (1, W))
    bl_t = jnp.tile(p["bl"].astype(f32), (1, W))

    w1_bd = _block_diag(p["w1"], W).astype(bf16)                          # (KC, KC)
    w2_m = jnp.concatenate([_conv_band(p["w2"][dy], W) for dy in range(3)],
                           axis=0).astype(bf16)                           # (3*KC, KC)
    w_out = jnp.concatenate([_block_diag(p["w3"], W),
                             _block_diag(p["wl"], W)],
                            axis=0).astype(bf16)                          # (2*KC, OC)

    params = [sa_t, ba_t, w1_bd, s2_t, b2_t, w2_m, s3_t, b3_t, sl_t, bl_t, w_out]

    vmem_cap = _vmem_capacity_bytes()
    G = group if group is not None else _choose_group(
        N, H, KC, OC, vmem_cap, target_step_bytes)
    assert N % G == 0, (N, G)
    grid = (N // G,)

    x_spec = pl.BlockSpec((G * H, KC), lambda g: (g, 0))
    out_spec = pl.BlockSpec((G * H, OC), lambda g: (g, 0))

    def resident(arr):
        nd = arr.ndim
        return pl.BlockSpec(arr.shape, lambda g: (0,) * nd)
    # TODO(synk): on v7x with large W*C, single-buffer these constant-index residents
    # (pipeline_mode=pl.Buffered(1)) or stage them into scratch to halve their VMEM use.

    # Per-chip VMEM budget: ~80% of physical (v7x 64 MiB -> ~51 MiB, v5e/v6e 128 MiB
    # -> ~102 MiB), and never more than ~4x the estimated working set.
    param_bytes = sum(int(a.size) * a.dtype.itemsize for a in params)
    step_bytes = G * H * (KC * 2 + OC * 4)
    est = 2 * step_bytes + 2 * param_bytes + 48 * G * H * KC
    vmem_limit = int(min(int(0.8 * vmem_cap), max(32 * 2 ** 20, 4 * est)))

    out_flat = pl.pallas_call(
        functools.partial(_dr_block_kernel, H),
        out_shape=jax.ShapeDtypeStruct((N * H, OC), f32),
        grid=grid,
        in_specs=[x_spec] + [resident(a) for a in params],
        out_specs=out_spec,
        compiler_params=pltpu.CompilerParams(
            dimension_semantics=("parallel",),
            vmem_limit_bytes=vmem_limit),
    )(x_folded, *params)

    # Back to NCHW only for interface parity with the PyTorch module.
    # TODO(synk): in a real network keep the (rows, lanes) layout / bf16 output instead.
    return jnp.transpose(out_flat.reshape(N, H, W, C2), (0, 3, 1, 2))


# -----------------------------------------------------------------------------
# Parameters & reference
# -----------------------------------------------------------------------------
def init_params(key, C, eps=1e-5):
    """Deterministic synthetic parameters matching DR_Block(in_channel=C)."""
    C2 = 2 * C
    keys = jax.random.split(key, 8)

    def bn(k, ch):
        k1, k2, k3, k4 = jax.random.split(k, 4)
        gamma = 1.0 + 0.1 * jax.random.normal(k1, (ch,), jnp.float32)
        beta = 0.1 * jax.random.normal(k2, (ch,), jnp.float32)
        mean = 0.1 * jax.random.normal(k3, (ch,), jnp.float32)
        var = jax.random.uniform(k4, (ch,), jnp.float32, 0.5, 1.5)
        scale = gamma * lax.rsqrt(var + eps)
        shift = beta - mean * scale
        return scale.reshape(1, ch), shift.reshape(1, ch)

    sa, ba = bn(keys[0], C)   # M.bottleneck BN #1 (applied to x)
    s2, b2 = bn(keys[1], C)   # BN after 1x1 conv
    s3, b3 = bn(keys[2], C)   # BN after 3x3 conv
    sl, bl = bn(keys[3], C)   # layer BN (applied to x)

    # Conv weights generated in PyTorch (Cout, Cin, kh, kw) layout, converted to the
    # matmul layouts the wrapper consumes.
    w1_t = 0.3 * jax.random.normal(keys[4], (C, C, 1, 1), jnp.float32)
    w2_t = 0.3 * jax.random.normal(keys[5], (C, C, 3, 3), jnp.float32)
    w3_t = 0.3 * jax.random.normal(keys[6], (C2, C, 1, 1), jnp.float32)
    wl_t = 0.3 * jax.random.normal(keys[7], (C2, C, 1, 1), jnp.float32)

    w1 = jnp.transpose(w1_t[:, :, 0, 0], (1, 0))   # (Cin, Cout)
    w2 = jnp.transpose(w2_t, (2, 3, 1, 0))         # (kh, kw, Cin, Cout)
    w3 = jnp.transpose(w3_t[:, :, 0, 0], (1, 0))   # (Cin, 2C)
    wl = jnp.transpose(wl_t[:, :, 0, 0], (1, 0))   # (Cin, 2C)

    return dict(sa=sa, ba=ba, w1=w1, s2=s2, b2=b2, w2=w2,
                s3=s3, b3=b3, w3=w3, sl=sl, bl=bl, wl=wl)


def dr_block_reference(x_nhwc, p):
    """Pure-JAX NHWC reference mirroring the kernel's precision choices: x quantized to
    bf16 (HBM storage), element-wise math f32, matmuls bf16 with f32 accumulation."""
    f32 = jnp.float32
    bf16 = jnp.bfloat16
    N, H, W, C = x_nhwc.shape
    x = x_nhwc.astype(bf16).astype(f32)

    def bn_relu(t, s, b):
        return jnp.maximum(t * s.reshape(1, 1, 1, -1) + b.reshape(1, 1, 1, -1), 0.0)

    def mm(a, w):
        return jnp.einsum("nhwc,cd->nhwd", a.astype(bf16), w.astype(bf16),
                          preferred_element_type=f32)

    h0 = bn_relu(x, p["sa"], p["ba"])
    y1 = bn_relu(mm(h0, p["w1"]), p["s2"], p["b2"])
    yp = jnp.pad(y1, ((0, 0), (1, 1), (1, 1), (0, 0)))
    acc = jnp.zeros((N, H, W, C), f32)
    for dy in range(3):
        for dx in range(3):
            acc = acc + mm(yp[:, dy:dy + H, dx:dx + W, :], p["w2"][dy, dx])
    h2 = bn_relu(acc, p["s3"], p["b3"])
    conv = mm(h2, p["w3"])
    hl = bn_relu(x, p["sl"], p["bl"])
    res = mm(hl, p["wl"])
    return res + conv


if __name__ == "__main__":
    key = jax.random.PRNGKey(0)
    N, C, H, W = 2, 4, 16, 16
    kx, kp = jax.random.split(key)

    x_nchw = jax.random.normal(kx, (N, C, H, W), jnp.float32)
    params = init_params(kp, C)

    out = dr_block(x_nchw, params)        # auto group -> 1 image/step, 2 pipelined steps
    jax.block_until_ready(out)
    assert out.shape == (N, 2 * C, H, W), out.shape

    ref_nhwc = dr_block_reference(jnp.transpose(x_nchw, (0, 2, 3, 1)), params)
    ref = jnp.transpose(ref_nhwc, (0, 3, 1, 2))
    err = float(jnp.max(jnp.abs(out - ref)))
    assert jnp.allclose(out, ref, atol=1e-2, rtol=1e-2), err

    print("KERNEL_OK")
</pallas_src>

<mosaic_0001>
module attributes {stable_mosaic.version = 11 : i64} {
  func.func @_dr_block_kernel(%arg0: i32, %arg1: memref<16x64xbf16, #tpu.memory_space<vmem>>, %arg2: memref<1x64xf32, #tpu.memory_space<vmem>>, %arg3: memref<1x64xf32, #tpu.memory_space<vmem>>, %arg4: memref<64x64xbf16, #tpu.memory_space<vmem>>, %arg5: memref<1x64xf32, #tpu.memory_space<vmem>>, %arg6: memref<1x64xf32, #tpu.memory_space<vmem>>, %arg7: memref<192x64xbf16, #tpu.memory_space<vmem>>, %arg8: memref<1x64xf32, #tpu.memory_space<vmem>>, %arg9: memref<1x64xf32, #tpu.memory_space<vmem>>, %arg10: memref<1x64xf32, #tpu.memory_space<vmem>>, %arg11: memref<1x64xf32, #tpu.memory_space<vmem>>, %arg12: memref<128x128xbf16, #tpu.memory_space<vmem>>, %arg13: memref<16x128xf32, #tpu.memory_space<vmem>>) attributes {dimension_semantics = [#tpu.dimension_semantics<parallel>], iteration_bounds = array<i64: 2>, scalar_prefetch = 0 : i64, scratch_operands = 0 : i64, tpu.core_type = #tpu.core_type<tc>, window_params = [{transform_indices = @transform_0, window_bounds = array<i64: 16, 64>}, {pipeline_mode = #tpu.pipeline_mode<synchronous>, transform_indices = @transform_1, window_bounds = array<i64: 1, 64>}, {pipeline_mode = #tpu.pipeline_mode<synchronous>, transform_indices = @transform_2, window_bounds = array<i64: 1, 64>}, {pipeline_mode = #tpu.pipeline_mode<synchronous>, transform_indices = @transform_3, window_bounds = array<i64: 64, 64>}, {pipeline_mode = #tpu.pipeline_mode<synchronous>, transform_indices = @transform_4, window_bounds = array<i64: 1, 64>}, {pipeline_mode = #tpu.pipeline_mode<synchronous>, transform_indices = @transform_5, window_bounds = array<i64: 1, 64>}, {pipeline_mode = #tpu.pipeline_mode<synchronous>, transform_indices = @transform_6, window_bounds = array<i64: 192, 64>}, {pipeline_mode = #tpu.pipeline_mode<synchronous>, transform_indices = @transform_7, window_bounds = array<i64: 1, 64>}, {pipeline_mode = #tpu.pipeline_mode<synchronous>, transform_indices = @transform_8, window_bounds = array<i64: 1, 64>}, {pipeline_mode = #tpu.pipeline_mode<synchronous>, transform_indices = @transform_9, window_bounds = array<i64: 1, 64>}, {pipeline_mode = #tpu.pipeline_mode<synchronous>, transform_indices = @transform_10, window_bounds = array<i64: 1, 64>}, {pipeline_mode = #tpu.pipeline_mode<synchronous>, transform_indices = @transform_11, window_bounds = array<i64: 128, 128>}, {transform_indices = @transform_12, window_bounds = array<i64: 16, 128>}]} {
    %c0 = arith.constant 0 : index
    %c0_0 = arith.constant 0 : index
    %0 = vector.load %arg1[%c0, %c0_0] : memref<16x64xbf16, #tpu.memory_space<vmem>>, vector<16x64xbf16>
    %1 = arith.extf %0 : vector<16x64xbf16> to vector<16x64xf32>
    %c0_1 = arith.constant 0 : index
    %c0_2 = arith.constant 0 : index
    %2 = vector.load %arg2[%c0_1, %c0_2] : memref<1x64xf32, #tpu.memory_space<vmem>>, vector<1x64xf32>
    %3 = vector.broadcast %2 : vector<1x64xf32> to vector<16x64xf32>
    %4 = arith.mulf %1, %3 : vector<16x64xf32>
    %c0_3 = arith.constant 0 : index
    %c0_4 = arith.constant 0 : index
    %5 = vector.load %arg3[%c0_3, %c0_4] : memref<1x64xf32, #tpu.memory_space<vmem>>, vector<1x64xf32>
    %6 = vector.broadcast %5 : vector<1x64xf32> to vector<16x64xf32>
    %7 = arith.addf %4, %6 : vector<16x64xf32>
    %cst = arith.constant 0.000000e+00 : f32
    %8 = vector.broadcast %cst : f32 to vector<16x64xf32>
    %9 = arith.maximumf %7, %8 : vector<16x64xf32>
    %10 = arith.truncf %9 : vector<16x64xf32> to vector<16x64xbf16>
    %c0_5 = arith.constant 0 : index
    %c0_6 = arith.constant 0 : index
    %11 = vector.load %arg4[%c0_5, %c0_6] : memref<64x64xbf16, #tpu.memory_space<vmem>>, vector<64x64xbf16>
    %cst_7 = arith.constant dense<0.000000e+00> : vector<16x64xf32>
    %12 = tpu.matmul %10, %11, %cst_7 {dimension_numbers = #tpu.dot_dimension_numbers<[1], [0], [0], [1], [0, 0, 1, 1], [], []>} : vector<16x64xbf16>, vector<64x64xbf16>, vector<16x64xf32> -> vector<16x64xf32>
    %c0_8 = arith.constant 0 : index
    %c0_9 = arith.constant 0 : index
    %13 = vector.load %arg5[%c0_8, %c0_9] : memref<1x64xf32, #tpu.memory_space<vmem>>, vector<1x64xf32>
    %14 = vector.broadcast %13 : vector<1x64xf32> to vector<16x64xf32>
    %15 = arith.mulf %12, %14 : vector<16x64xf32>
    %c0_10 = arith.constant 0 : index
    %c0_11 = arith.constant 0 : index
    %16 = vector.load %arg6[%c0_10, %c0_11] : memref<1x64xf32, #tpu.memory_space<vmem>>, vector<1x64xf32>
    %17 = vector.broadcast %16 : vector<1x64xf32> to vector<16x64xf32>
    %18 = arith.addf %15, %17 : vector<16x64xf32>
    %cst_12 = arith.constant 0.000000e+00 : f32
    %19 = vector.broadcast %cst_12 : f32 to vector<16x64xf32>
    %20 = arith.maximumf %18, %19 : vector<16x64xf32>
    %cst_13 = arith.constant 0.000000e+00 : f32
    %21 = vector.broadcast %cst_13 : f32 to vector<1x64xf32>
    %22 = tpu.concatenate %21, %20, %21 in 0 : vector<1x64xf32>, vector<16x64xf32>, vector<1x64xf32> -> vector<18x64xf32>
    %23 = tpu.iota {dimensions = array<i32: 0>} : vector<16x64xi32>
    %c16_i32 = arith.constant 16 : i32
    %c0_i32 = arith.constant 0 : i32
    %24 = arith.cmpi eq, %c16_i32, %c0_i32 : i32
    %c1_i32 = arith.constant 1 : i32
    %25 = arith.select %24, %c1_i32, %c16_i32 : i32
    %26 = vector.broadcast %25 : i32 to vector<16x64xi32>
    %27 = arith.remsi %23, %26 : vector<16x64xi32>
    %c0_i32_14 = arith.constant 0 : i32
    %28 = vector.broadcast %c0_i32_14 : i32 to vector<16x64xi32>
    %29 = arith.cmpi ne, %27, %28 : vector<16x64xi32>
    %c0_i32_15 = arith.constant 0 : i32
    %30 = vector.broadcast %c0_i32_15 : i32 to vector<16x64xi32>
    %31 = arith.cmpi slt, %27, %30 : vector<16x64xi32>
    %c0_i32_16 = arith.constant 0 : i32
    %32 = arith.cmpi slt, %25, %c0_i32_16 : i32
    %33 = vector.broadcast %32 : i1 to vector<16x64xi1>
    %34 = vector.broadcast %33 : vector<16x64xi1> to vector<16x64xi1>
    %35 = arith.xori %31, %34 : vector<16x64xi1>
    %36 = arith.andi %35, %29 : vector<16x64xi1>
    %37 = vector.broadcast %25 : i32 to vector<16x64xi32>
    %38 = arith.addi %27, %37 : vector<16x64xi32>
    %39 = arith.select %36, %38, %27 : vector<16x64xi1>, vector<16x64xi32>
    %c0_i32_17 = arith.constant 0 : i32
    %40 = vector.broadcast %c0_i32_17 : i32 to vector<16x64xi32>
    %41 = arith.cmpi eq, %39, %40 : vector<16x64xi32>
    %42 = vector.extract_strided_slice %22 {offsets = [0, 0], sizes = [16, 64], strides = [1, 1]} : vector<18x64xf32> to vector<16x64xf32>
    %cst_18 = arith.constant 0.000000e+00 : f32
    %43 = vector.broadcast %cst_18 : f32 to vector<16x64xf32>
    %44 = arith.select %41, %43, %42 : vector<16x64xi1>, vector<16x64xf32>
    %c15_i32 = arith.constant 15 : i32
    %45 = vector.broadcast %c15_i32 : i32 to vector<16x64xi32>
    %46 = arith.cmpi eq, %39, %45 : vector<16x64xi32>
    %47 = vector.extract_strided_slice %22 {offsets = [2, 0], sizes = [16, 64], strides = [1, 1]} : vector<18x64xf32> to vector<16x64xf32>
    %cst_19 = arith.constant 0.000000e+00 : f32
    %48 = vector.broadcast %cst_19 : f32 to vector<16x64xf32>
    %49 = arith.select %46, %48, %47 : vector<16x64xi1>, vector<16x64xf32>
    %50 = tpu.concatenate %44, %20, %49 in 1 : vector<16x64xf32>, vector<16x64xf32>, vector<16x64xf32> -> vector<16x192xf32>
    %51 = arith.truncf %50 : vector<16x192xf32> to vector<16x192xbf16>
    %c0_20 = arith.constant 0 : index
    %c0_21 = arith.constant 0 : index
    %52 = vector.load %arg7[%c0_20, %c0_21] : memref<192x64xbf16, #tpu.memory_space<vmem>>, vector<192x64xbf16>
    %cst_22 = arith.constant dense<0.000000e+00> : vector<16x64xf32>
    %53 = tpu.matmul %51, %52, %cst_22 {dimension_numbers = #tpu.dot_dimension_numbers<[1], [0], [0], [1], [0, 0, 1, 1], [], []>} : vector<16x192xbf16>, vector<192x64xbf16>, vector<16x64xf32> -> vector<16x64xf32>
    %c0_23 = arith.constant 0 : index
    %c0_24 = arith.constant 0 : index
    %54 = vector.load %arg8[%c0_23, %c0_24] : memref<1x64xf32, #tpu.memory_space<vmem>>, vector<1x64xf32>
    %55 = vector.broadcast %54 : vector<1x64xf32> to vector<16x64xf32>
    %56 = arith.mulf %53, %55 : vector<16x64xf32>
    %c0_25 = arith.constant 0 : index
    %c0_26 = arith.constant 0 : index
    %57 = vector.load %arg9[%c0_25, %c0_26] : memref<1x64xf32, #tpu.memory_space<vmem>>, vector<1x64xf32>
    %58 = vector.broadcast %57 : vector<1x64xf32> to vector<16x64xf32>
    %59 = arith.addf %56, %58 : vector<16x64xf32>
    %cst_27 = arith.constant 0.000000e+00 : f32
    %60 = vector.broadcast %cst_27 : f32 to vector<16x64xf32>
    %61 = arith.maximumf %59, %60 : vector<16x64xf32>
    %c0_28 = arith.constant 0 : index
    %c0_29 = arith.constant 0 : index
    %62 = vector.load %arg10[%c0_28, %c0_29] : memref<1x64xf32, #tpu.memory_space<vmem>>, vector<1x64xf32>
    %63 = vector.broadcast %62 : vector<1x64xf32> to vector<16x64xf32>
    %64 = arith.mulf %1, %63 : vector<16x64xf32>
    %c0_30 = arith.constant 0 : index
    %c0_31 = arith.constant 0 : index
    %65 = vector.load %arg11[%c0_30, %c0_31] : memref<1x64xf32, #tpu.memory_space<vmem>>, vector<1x64xf32>
    %66 = vector.broadcast %65 : vector<1x64xf32> to vector<16x64xf32>
    %67 = arith.addf %64, %66 : vector<16x64xf32>
    %cst_32 = arith.constant 0.000000e+00 : f32
    %68 = vector.broadcast %cst_32 : f32 to vector<16x64xf32>
    %69 = arith.maximumf %67, %68 : vector<16x64xf32>
    %70 = tpu.concatenate %61, %69 in 1 : vector<16x64xf32>, vector<16x64xf32> -> vector<16x128xf32>
    %71 = arith.truncf %70 : vector<16x128xf32> to vector<16x128xbf16>
    %c0_33 = arith.constant 0 : index
    %c0_34 = arith.constant 0 : index
    %72 = vector.load %arg12[%c0_33, %c0_34] : memref<128x128xbf16, #tpu.memory_space<vmem>>, vector<128x128xbf16>
    %cst_35 = arith.constant dense<0.000000e+00> : vector<16x128xf32>
    %73 = tpu.matmul %71, %72, %cst_35 {dimension_numbers = #tpu.dot_dimension_numbers<[1], [0], [0], [1], [0, 0, 1, 1], [], []>} : vector<16x128xbf16>, vector<128x128xbf16>, vector<16x128xf32> -> vector<16x128xf32>
    %c0_36 = arith.constant 0 : index
    %c0_37 = arith.constant 0 : index
    %74 = vector.load %arg13[%c0_36, %c0_37] : memref<16x128xf32, #tpu.memory_space<vmem>>, vector<16x128xf32>
    tpu.vector_store %arg13[%c0_36, %c0_37], %73 {strides = array<i32>} : memref<16x128xf32, #tpu.memory_space<vmem>>, vector<16x128xf32>,
    return
  }
  func.func @transform_0(%arg0: i32) -> (i32, i32) {
    %c0_i32 = arith.constant 0 : i32
    %c0_i32_0 = arith.constant 0 : i32
    return %arg0, %c0_i32 : i32, i32
  }
  func.func @transform_1(%arg0: i32) -> (i32, i32) {
    %c0_i32 = arith.constant 0 : i32
    %c0_i32_0 = arith.constant 0 : i32
    %c0_i32_1 = arith.constant 0 : i32
    return %c0_i32, %c0_i32_0 : i32, i32
  }
  func.func @transform_2(%arg0: i32) -> (i32, i32) {
    %c0_i32 = arith.constant 0 : i32
    %c0_i32_0 = arith.constant 0 : i32
    %c0_i32_1 = arith.constant 0 : i32
    return %c0_i32, %c0_i32_0 : i32, i32
  }
  func.func @transform_3(%arg0: i32) -> (i32, i32) {
    %c0_i32 = arith.constant 0 : i32
    %c0_i32_0 = arith.constant 0 : i32
    %c0_i32_1 = arith.constant 0 : i32
    return %c0_i32, %c0_i32_0 : i32, i32
  }
  func.func @transform_4(%arg0: i32) -> (i32, i32) {
    %c0_i32 = arith.constant 0 : i32
    %c0_i32_0 = arith.constant 0 : i32
    %c0_i32_1 = arith.constant 0 : i32
    return %c0_i32, %c0_i32_0 : i32, i32
  }
  func.func @transform_5(%arg0: i32) -> (i32, i32) {
    %c0_i32 = arith.constant 0 : i32
    %c0_i32_0 = arith.constant 0 : i32
    %c0_i32_1 = arith.constant 0 : i32
    return %c0_i32, %c0_i32_0 : i32, i32
  }
  func.func @transform_6(%arg0: i32) -> (i32, i32) {
    %c0_i32 = arith.constant 0 : i32
    %c0_i32_0 = arith.constant 0 : i32
    %c0_i32_1 = arith.constant 0 : i32
    return %c0_i32, %c0_i32_0 : i32, i32
  }
  func.func @transform_7(%arg0: i32) -> (i32, i32) {
    %c0_i32 = arith.constant 0 : i32
    %c0_i32_0 = arith.constant 0 : i32
    %c0_i32_1 = arith.constant 0 : i32
    return %c0_i32, %c0_i32_0 : i32, i32
  }
  func.func @transform_8(%arg0: i32) -> (i32, i32) {
    %c0_i32 = arith.constant 0 : i32
    %c0_i32_0 = arith.constant 0 : i32
    %c0_i32_1 = arith.constant 0 : i32
    return %c0_i32, %c0_i32_0 : i32, i32
  }
  func.func @transform_9(%arg0: i32) -> (i32, i32) {
    %c0_i32 = arith.constant 0 : i32
    %c0_i32_0 = arith.constant 0 : i32
    %c0_i32_1 = arith.constant 0 : i32
    return %c0_i32, %c0_i32_0 : i32, i32
  }
  func.func @transform_10(%arg0: i32) -> (i32, i32) {
    %c0_i32 = arith.constant 0 : i32
    %c0_i32_0 = arith.constant 0 : i32
    %c0_i32_1 = arith.constant 0 : i32
    return %c0_i32, %c0_i32_0 : i32, i32
  }
  func.func @transform_11(%arg0: i32) -> (i32, i32) {
    %c0_i32 = arith.constant 0 : i32
    %c0_i32_0 = arith.constant 0 : i32
    %c0_i32_1 = arith.constant 0 : i32
    return %c0_i32, %c0_i32_0 : i32, i32
  }
  func.func @transform_12(%arg0: i32) -> (i32, i32) {
    %c0_i32 = arith.constant 0 : i32
    %c0_i32_0 = arith.constant 0 : i32
    return %arg0, %c0_i32 : i32, i32
  }
}

</mosaic_0001>

<bundles_post_ra>
// kernel: tpu_custom_call.1
= control target key start
LH: loop header
LB: loop body
LE: loop exit
PB: predicated region body
PF: predicated region fallthrough
CT: control target
= control target key end

     0   :  { %s1427_s0 = inlined_call_operand.vmem [shape: bf16[32,64], index: 0, kind: input, shape index: {}]   ;;  %s1428_s1 = inlined_call_operand.vmem [shape: f32[1,64], index: 1, kind: input, shape index: {}]   ;;  %s1429_s2 = inlined_call_operand.vmem [shape: f32[1,64], index: 2, kind: input, shape index: {}]   ;;  %s1430_s3 = inlined_call_operand.vmem [shape: bf16[64,64], index: 3, kind: input, shape index: {}]   ;;  %s1431_s4 = inlined_call_operand.vmem [shape: f32[1,64], index: 4, kind: input, shape index: {}]   ;;  %s1432_s5 = inlined_call_operand.vmem [shape: f32[1,64], index: 5, kind: input, shape index: {}]   ;;  %s1433_s6 = inlined_call_operand.vmem [shape: bf16[192,64], index: 6, kind: input, shape index: {}]   ;;  %s1434_s7 = inlined_call_operand.vmem [shape: f32[1,64], index: 7, kind: input, shape index: {}]   ;;  %s1435_s8 = inlined_call_operand.vmem [shape: f32[1,64], index: 8, kind: input, shape index: {}]   ;;  %s1436_s9 = inlined_call_operand.vmem [shape: f32[1,64], index: 9, kind: input, shape index: {}]   ;;  %s1437_s10 = inlined_call_operand.vmem [shape: f32[1,64], index: 10, kind: input, shape index: {}]   ;;  %s1438_s11 = inlined_call_operand.vmem [shape: bf16[128,128], index: 11, kind: input, shape index: {}]   ;;  %s1439_s12 = inlined_call_operand.hbm [shape: f32[32,128], index: 12, kind: output, shape index: {}]  }
   0x1   :  { %1441 = sst [smem:[#allocation7_spill]] %s1427_s0 }
   0x2   :  { %1442 = sst [smem:[#allocation8_spill]] %s1428_s1 }
   0x3   :  { %17 = vsyncpa [#allocation3], 0 }
   0x4   :  { %19 = vsyncpa [#allocation3 + $0x1], 0  ;;  %s1220_s21 = smov 0   ;;  %s1222_s22 = smov 0  }
   0x5   :  { %s1224_s23 = smov 0   ;;  %s1226_s24 = smov 0  }
   0x6 LB: > { %1443 = sst [smem:[#allocation5_spill]] %s1146_s23  ;;  %s1241_s25 = sadd.s32 4294967295, %s1150_s24   ;;  %s1150_s24 = sphi %s1226_s24, %s1455_s24   ;;  %s1146_s23 = sphi %s1224_s23, %s1452_s23   ;;  %s1142_s22 = sphi %s1222_s22, %s1454_s22   ;;  %s1138_s21 = sphi %s1220_s21, %s1453_s21  }
   0x7   : > { %s889_s26 = sadd.s32 4294967294, %s1150_s24   ;;  %s1245_s27 = sadd.s32 1, %s1150_s24  }
   0x8   : > { %s289_s28 = sadd.s32 1, %s1146_s23  ;;  %s286_s29 = ssub.s32 %s1150_s24, %s1245_s27 }
   0x9   : > { %p299_p0 = scmp.ne.s32.totalorder %s1146_s23, %s1142_s22  ;;  %p287_p1 = scmp.eq.s32.totalorder %s286_s29, 0 }
   0xa   : > { %p300_p2 = scmp.eq.s32.totalorder %s1241_s25, 1  ;;  %p305_p3 = scmp.ne.s32.totalorder %s1142_s22, %s1138_s21 }
   0xb   : > { %p306_p4 = scmp.eq.s32.totalorder %s889_s26, 1  ;;  %p892_p7 = scmp.ge.s32.totalorder %s1150_s24, 1 }
   0xc   : > { %s1256_s30 = scalar_select %p287_p1, %s1146_s23, %s289_s28  }
   0xd   : > { %p1258_p5 = por %p300_p2, %p299_p0  ;;  %p1262_p6 = por %p306_p4, %p305_p3 }
   0xe   : > { %1444 = sst [smem:[#allocation6_spill]] %s1256_s30  ;;  %p366_p8 = scmp.lt.s32.totalorder %s1150_s24, 3 }
  0x10   : > { %p367_p9 = pnand %p892_p7, %p366_p8 }
  0x11   : > { %s894_s17 = sshll.u32 (!%p367_p9), %s1241_s25, 1  ;;  %s1447_s0 = sld [smem:[#allocation7_spill]] (!%p367_p9) }
  0x12   : > { %370 = sbr.rel (%p367_p9) target bundleno = 590 (0x24e), region = 68  ;;  %p409_p10 = scmp.lt.s32.totalorder (!%p367_p9), %s894_s17, 3 }
  0x13   : > { %s1448_s1 = sld [smem:[#allocation8_spill]] (!%p367_p9)  ;;  %s1152_s29 = smov (!%p367_p9), 64  }
  0x14   : > { %s405_s19 = sand.u32 (!%p367_p9), 1, %s1142_s22   ;;  %s1023_s23 = sshll.u32 (!%p367_p9), %s1241_s25, 4 }
  0x15   : > { %s893_s26 = sshll.u32 (!%p367_p9), %s405_s19, 4  ;;  %s823_s28 = scalar_lea.hbm (!%p367_p9), %s1439_s12, %s1023_s23 }
  0x16   : > { %s826_s16 = sshll.u32 (!%p367_p9), %s823_s28, 4  ;;  %s1108_s23 = scalar_lea.hbm (!%p367_p9), %s1439_s12, 32  ;;  %s827_s16 = int_to_ptr.hbm [resolvable:$true] %s826_s16 }
  0x17   : > { %v1002_v0 = vld [vmem:[%s1430_s3 + $0x18] sm:$0xff]  ;;  %v1001_v1 = vld [vmem:[%s1430_s3 + $0x10] sm:$0xff]  ;;  %s1457_s17 = smov (!%p409_p10, %s894_s17), 3  ;;  %v1000_v2 = vld [vmem:[%s1430_s3 + $0x8] sm:$0xff]  ;;  %vm467_vm0 = vcmask 523264   ;;  %v510_v22 = vlaneseq  ;;  %vm501_vm1 = vcmask 1040384  }
  0x18   : > { %475 = vmatpush.bf16.msra.mxu0 %v1002_v0  ;;  %s895_s20 = sshll.u32 %s1457_s17, 2  ;;  %v1081_v7 = vld [vmem:[%s1429_s2] ss:$0 sm:$0xff]  ;;  %v1014_v16 = vld [vmem:[%s1433_s6 + $0x58] sm:$0xff]  ;;  %v1013_v17 = vld [vmem:[%s1433_s6 + $0x50] sm:$0xff]  ;;  %vm545_vm3 = vcmask 1045504  }
  0x19   : > { %s412_s15 = scalar_lea.vmem %s1447_s0, %s895_s20  ;;  %v1080_v3 = vld [vmem:[%s1448_s1] ss:$0 sm:$0xff]  ;;  %682 = vmatpush.bf16.msra.mxu2 %v1014_v16  ;;  %v1012_v18 = vld [vmem:[%s1433_s6 + $0x48] sm:$0xff]  ;;  %v1010_v20 = vld [vmem:[%s1433_s6 + $0x38] sm:$0xff]  ;;  %v511_v26 = vshrl.u32 %v510_v22, 7  ;;  %s812_s17 = scalar_lea.sflag [#allocation3], %s405_s19 }
  0x1a   : > { %v1284_v4 = vld [vmem:[%s412_s15] sm:$0xff]   ;;  %664 = vmatpush.bf16.msra.mxu1 %v1010_v20  ;;  %v1009_v21 = vld [vmem:[%s1433_s6 + $0x30] sm:$0xff]  ;;  %v1008_v24 = vld [vmem:[%s1433_s6 + $0x28] sm:$0xff]  ;;  %s1102_s18 = sshra.s32 %s827_s16, 4  ;;  %s1103_s18 = int_to_ptr.hbm [resolvable:$true] %s1102_s18 }
  0x1b   : > { %v1026_v5 = vunpack.c.l.bf16 %v1284_v4  ;;  %v1027_v6 = vunpack.c.h.bf16 %v1284_v4  ;;  %v999_v8 = vld [vmem:[%s1430_s3] sm:$0xff]  ;;  %v517_v31 = vand.u32 15, %v511_v26  ;;  %v1006_v33 = vld [vmem:[%s1433_s6 + $0x18] sm:$0xff]  ;;  %v512_v39 = vadd.s32 8, %v511_v26  ;;  %v1005_v40 = vld [vmem:[%s1433_s6 + $0x10] sm:$0xff]  ;;  %s1104_s0 = scalar_lea.hbm %s1103_s18, 16  ;;  %p1109_p0 = scmp.lt.s32.totalorder %s1103_s18, %s1439_s12 }
  0x1c   : > { %476 = vmatpush.bf16.msra.mxu0 %v1001_v1  ;;  %v1011_v19 = vld [vmem:[%s1433_s6 + $0x40] sm:$0xff]  ;;  %v1004_v45 = vld [vmem:[%s1433_s6 + $0x8] sm:$0xff]  ;;  %p1105_p11 = scmp.ne.s32.totalorder %s1103_s18, %s1104_s0  ;;  %p1110_p1 = scmp.lt.s32.totalorder %s1108_s23, %s1104_s0 }
  0x1d   : > { %v424_v9 = vmul.f32 %v1080_v3, %v1026_v5  ;;  %v425_v10 = vmul.f32 %v1080_v3, %v1027_v6  ;;  %683 = vmatpush.bf16.msra.mxu2 %v1013_v17  ;;  %v1082_v23 = vld [vmem:[%s1431_s4] ss:$0 sm:$0xff]  ;;  %vm1332_vm2 = vcmp.eq.s32.totalorder %v517_v31, 0  ;;  %v524_v44 = vand.u32 15, %v512_v39 }
  0x1e   : > { %665 = vmatpush.bf16.msra.mxu1 %v1009_v21  ;;  %v1083_v25 = vld [vmem:[%s1432_s5] ss:$0 sm:$0xff]  ;;  %p1106_p12 = pnand %p1105_p11, %p1258_p5  ;;  %p1111_p2 = por %p1110_p1, %p1109_p0 }
  0x1f   : > { %v430_v11 = vadd.f32 %v1081_v7, %v424_v9  ;;  %v431_v12 = vadd.f32 %v1081_v7, %v425_v10  ;;  %v1007_v29 = vld [vmem:[%s1433_s6 + $0x20] sm:$0xff]  ;;  %vm542_vm4 = vcmp.eq.s32.totalorder %v524_v44, 15  ;;  %v1022_v7 = vld [vmem:[%s1438_s11 + $0x38] sm:$0xff] }
  0x20   : > { %477 = vmatpush.bf16.msra.mxu0 %v1000_v2  ;;  %v1003_v57 = vld [vmem:[%s1433_s6] sm:$0xff]  ;;  %795 = vmatpush.bf16.msra.mxu3 %v1022_v7  ;;  %p1107_p13 = pneg %p1106_p12 }
  0x21   : > { %v432_v13 = vmax.f32 %v430_v11, 0.0  ;;  %v433_v14 = vmax.f32 %v431_v12, 0.0  ;;  %684 = vmatpush.bf16.msra.mxu2 %v1012_v18  ;;  %v1084_v58 = vld [vmem:[%s1436_s9] ss:$0 sm:$0xff]  ;;  %v1020_v11 = vld [vmem:[%s1438_s11 + $0x28] sm:$0xff] }
  0x22   : > { %666 = vmatpush.bf16.msra.mxu1 %v1008_v24  ;;  %v1085_v59 = vld [vmem:[%s1437_s10] ss:$0 sm:$0xff]  ;;  %v710_v60 = vmul.f32 %v1084_v58, %v1026_v5  ;;  %v711_v61 = vmul.f32 %v1084_v58, %v1027_v6  ;;  %v1021_v5 = vld [vmem:[%s1438_s11 + $0x30] sm:$0xff]  ;;  %p1112_p3 = pnand %p1111_p2, %p1107_p13 }
  0x23   : > { %v434_v15 = vpack.c.bf16 %v433_v14, %v432_v13  ;;  %v1019_v12 = vld [vmem:[%s1438_s11 + $0x20] sm:$0xff]  ;;  %v1018_v13 = vld [vmem:[%s1438_s11 + $0x18] sm:$0xff]  ;;  %v1017_v14 = vld [vmem:[%s1438_s11 + $0x10] sm:$0xff] }
  0x24   : > { %478 = vmatpush.bf16.msra.mxu0 %v999_v8  ;;  %v716_v62 = vadd.f32 %v1085_v59, %v710_v60  ;;  %v717_v63 = vadd.f32 %v1085_v59, %v711_v61  ;;  %796 = vmatpush.bf16.msra.mxu3 %v1021_v5  ;;  %v1015_v16 = vld [vmem:[%s1438_s11] sm:$0xff] }
  0x25   : > { %685 = vmatpush.bf16.msra.mxu2 %v1011_v19  ;;  %v1086_v20 = vld [vmem:[%s1434_s7] ss:$0 sm:$0xff] }
  0x26   : > { %667 = vmatpush.bf16.msra.mxu1 %v1007_v29  ;;  %v718_v0 = vmax.f32 %v716_v62, 0.0  ;;  %v719_v1 = vmax.f32 %v717_v63, 0.0  ;;  %v1087_v22 = vld [vmem:[%s1435_s8] ss:$0 sm:$0xff] }
  0x27   : > { %912 = vmatmul.msk.bf16.vlgmr.msra.gmra.mxu0 %vm467_vm0, %v434_v15  ;;  %v1016_v15 = vld [vmem:[%s1438_s11 + $0x8] sm:$0xff] }
  0x28   : > { %v1075_v2 = vpack.i.bf16 %v719_v1, %v718_v0  ;;  %797 = vmatpush.bf16.msra.mxu3 %v1020_v11 }
  0x2a   : > { %668 = vmatpush.bf16.msra.mxu1 %v1006_v33 }
  0x2c   : > { %798 = vmatpush.bf16.msra.mxu3 %v1019_v12 }
  0x2e   : > { %669 = vmatpush.bf16.msra.mxu1 %v1005_v40 }
  0x30   : > { %799 = vmatpush.bf16.msra.mxu3 %v1018_v13 }
  0x32   : > { %670 = vmatpush.bf16.msra.mxu1 %v1004_v45 }
  0x34   : > { %800 = vmatpush.bf16.msra.mxu3 %v1017_v14 }
  0x36   : > { %671 = vmatpush.bf16.msra.mxu1 %v1003_v57 }
  0x38   : > { %801 = vmatpush.bf16.msra.mxu3 %v1016_v15 }
  0x3c   : > { %802 = vmatpush.bf16.msra.mxu3 %v1015_v16 }
  0xa4   : > { %v480_v27 = vpop.f32.mrf.mxu0 }
  0xa5   : > { %v489_v28 = vmul.f32 %v1082_v23, %v480_v27 }
  0xa7   : > { %v495_v30 = vadd.f32 %v1083_v25, %v489_v28 }
  0xa9   : > { %v497_v32 = vmax.f32 %v495_v30, 0.0 }
  0xab   : > { %v502_v34 = vrot.slane %v497_v32, 7 }
  0xac   : > { %v482_v36 = vpop.f32.mrf.mxu0 }
  0xad   : > { %v508_v37 = vsel %vm501_vm1, 0.0, %v502_v34  ;;  %v490_v38 = vmul.f32 %v1082_v23, %v482_v36 }
  0xae   : > { %v539_v41 = vsel %vm1332_vm2, 0.0, %v508_v37  ;;  %v546_v50 = vrot.slane %v508_v37, 2 }
  0xaf   : > { %v496_v42 = vadd.f32 %v1083_v25, %v490_v38 }
  0xb1   : > { %v498_v43 = vmax.f32 %v496_v42, 0.0 }
  0xb3   : > { %v503_v46 = vrot.slane %v498_v43, 7  ;;  %v1070_v47 = vpack.i.bf16 %v498_v43, %v497_v32 }
  0xb5   : > { %v504_v48 = vsel %vm501_vm1, %v502_v34, %v503_v46  ;;  %v509_v49 = vsel %vm501_vm1, %v503_v46, 0.0  ;;  %1071 = vrot.lane.b32.xlu0 %v1070_v47, %s1152_s29 }
  0xb6   : > { %v549_v51 = vrot.slane %v509_v49, 2  ;;  %v547_v52 = vrot.slane %v504_v48, 2 }
  0xb8   : > { %v548_v53 = vsel %vm545_vm3, %v546_v50, %v547_v52  ;;  %v550_v54 = vsel %vm545_vm3, %v547_v52, %v549_v51 }
  0xb9   : > { %v554_v55 = vsel %vm542_vm4, 0.0, %v550_v54 }
  0xba   : > { %v564_v56 = vpack.c.bf16 %v554_v55, %v548_v53 }
  0xbc   : > { %961 = vmatmul.msk.bf16.vlgmr.msra.gmra.mxu2 %vm467_vm0, %v564_v56 }
  0xbd   : > { %1076 = vrot.lane.b32.xlu0 %v1075_v2, %s1152_s29  ;;  %s407_s29 = scalar_lea.vmem [#allocation2], %s893_s26 }
  0xbe   : > { %s824_s15 = sshll.u32 %s407_s29, 4  ;;  %s825_s15 = int_to_ptr.vmem [resolvable:$true] %s824_s15 }
 0x127   : > { %v1072_v3 = vpop.permute.xlu0 %1071 }
 0x128   : > { %v1074_v8 = vunpack.i.h.bf16 %v1072_v3  ;;  %v1073_v9 = vunpack.i.l.bf16 %v1072_v3 }
 0x12a   : > { %v561_v4 = vsel %vm467_vm0, %v539_v41, %v1073_v9  ;;  %v562_v6 = vsel %vm467_vm0, %v504_v48, %v1074_v8 }
 0x12b   : > { %v563_v10 = vpack.c.bf16 %v562_v6, %v561_v4 }
 0x12d   : > { %672 = vmatmul.bf16.vlgmr.msra.gmra.mxu1 %v563_v10 }
 0x12f   : > { %v1077_v27 = vpop.permute.xlu0 %1076 }
 0x130   : > { %v1079_v30 = vunpack.i.h.bf16 %v1077_v27  ;;  %v1078_v31 = vunpack.i.l.bf16 %v1077_v27 }
 0x13f   : > { %v687_v17 = vpop.f32.mrf.mxu2 }
 0x147   : > { %v689_v23 = vpop.f32.mrf.mxu2 }
 0x1aa   : > { %v673_v18 = vpop.f32.mrf.mxu1 }
 0x1ab   : > { %v688_v19 = vadd.f32 %v687_v17, %v673_v18 }
 0x1ad   : > { %v696_v21 = vmul.f32 %v1086_v20, %v688_v19 }
 0x1af   : > { %v702_v25 = vadd.f32 %v1087_v22, %v696_v21 }
 0x1b1   : > { %v704_v29 = vmax.f32 %v702_v25, 0.0 }
 0x1b2   : > { %v675_v24 = vpop.f32.mrf.mxu1 }
 0x1b3   : > { %v690_v26 = vadd.f32 %v689_v23, %v675_v24  ;;  %v728_v34 = vsel %vm467_vm0, %v704_v29, %v1078_v31 }
 0x1b5   : > { %v697_v28 = vmul.f32 %v1086_v20, %v690_v26 }
 0x1b7   : > { %v703_v32 = vadd.f32 %v1087_v22, %v697_v28 }
 0x1b9   : > { %v705_v33 = vmax.f32 %v703_v32, 0.0 }
 0x1bb   : > { %v729_v35 = vsel %vm467_vm0, %v705_v33, %v1079_v30 }
 0x1bc   : > { %v730_v36 = vpack.c.bf16 %v729_v35, %v728_v34 }
 0x1be   : > { %803 = vmatmul.bf16.vlgmr.msra.gmra.mxu3 %v730_v36 }
 0x241   : > { %v804_v37 = vpop.f32.mrf.mxu3 }
 0x242   : > { %809 = vst [vmem:[%s407_s29] sm:$0xff] %v804_v37 }
 0x249   : > { %v806_v38 = vpop.f32.mrf.mxu3 }
 0x24a   : > { %810 = vst [vmem:[%s407_s29 + $0x8] sm:$0xff] %v806_v38 }
 0x24b   : > { %1115 = shalt.err (!%p1112_p3)
}
 0x24c   : > { %s1153_s19 = smov 128   ;;  %s1154_s20 = smov 8  }
 0x24d   : > { %1028 = dma.vmem_to_hbm [thread:$0]  (%p1258_p5), %s825_s15, 256, %s827_s16, %s812_s17, %s1153_s19, %s1153_s19, %s1154_s20  }
 0x24e PF: > { %p1034_p4 = scmp.ge.s32.totalorder %s1150_s24, 2  ;;  %s841_s1 = sand.u32 1, %s1138_s21  }
 0x24f   : > { %s842_s28 = scalar_lea.sflag [#allocation3], %s841_s1 }
 0x250   : > { %p1031_p7 = pnand %p1034_p4, %p1262_p6 }
 0x252   : > { %p1032_p8 = pneg %p1031_p7 }
 0x254   : > { %1133 = dma.done.wait (%p1032_p8), %s842_s28, 256  }
 0x255   : > { %1135 = vsyncadd (%p1032_p8), %s842_s28, 4294967040  ;;  %s1451_s0 = sld [smem:[#allocation5_spill]]  ;;  %p22_p9 = scmp.ge.s32.totalorder %s1245_s27, 4  }
 0x256   : > { %s1452_s23 = sld [smem:[#allocation6_spill]]  ;;  %s1453_s21 = smov %s1142_s22 }
 0x257   : > { %s1455_s24 = smov %s1245_s27  ;;  %24 = sbr.rel (!%p22_p9) target bundleno = 6 (0x6), region = 103 }
 0x25b   : > { %s1454_s22 = smov %s1451_s0 }
 0x25c   :  { %848 = vsyncpa [#allocation3], 1 }
 0x25d   :  { %850 = vsyncpa [#allocation3 + $0x1], 1 }

</bundles_post_ra>
